<compile_context>
chip_gen: v5e
topology: v5e:2x2
jax: 0.10.0
libtpu: 0.0.40
codegen_flags: <defaults>
</compile_context>

<pallas_src>
import functools
import math

import jax
import jax.numpy as jnp
from jax.experimental import pallas as pl
from jax.experimental.pallas import tpu as pltpu


def _round_up(a, b):
    return ((a + b - 1) // b) * b


def _label_smoothing_kernel(x_ref, tgt_ref, out_ref, *, confidence, fill,
                            ent_row, padding_idx, tv, pad_tile, pad_local):
    j = pl.program_id(1)                           # V-tile index (reduction axis)

    x = x_ref[...].astype(jnp.float32)             # (tn, tv) log-probs
    tgt = tgt_ref[...]                             # (tn, 1)  int32 class ids
    valid = tgt != padding_idx                     # (tn, 1)  non-padded rows

    # --- init: per-N-tile loss starts at n_valid * (constant entropy term) ---
    @pl.when(j == 0)
    def _():
        n_valid = jnp.sum(valid.astype(jnp.float32), axis=0, keepdims=True)
        out_ref[...] = jnp.broadcast_to(n_valid * ent_row, out_ref.shape)

    # --- cross term: sum_c td[n, c] * x[n, c] over this tile's columns -------
    xm = jnp.where(valid, x, 0.0)                  # zero padded rows
    col = jax.lax.broadcasted_iota(jnp.int32, x.shape, 1) + j * tv
    coef = jnp.where(col == tgt, confidence, fill)
    cross = jnp.sum(coef * xm, axis=1, keepdims=True)      # (tn, 1)
    cross = jnp.sum(cross, axis=0, keepdims=True)          # (1, 1)
    out_ref[...] = out_ref[...] - cross

    # --- padding column: td[:, padding_idx] == 0, undo the fill*x term -------
    @pl.when(j == pad_tile)
    def _():
        pad_x = jnp.sum(xm[:, pad_local:pad_local + 1], axis=0, keepdims=True)
        out_ref[...] = out_ref[...] + fill * pad_x


def label_smoothing_loss(x, target, *, size, padding_idx, smoothing,
                         tn=256, tv=2048):
    """x: (N, size) log-probs (f32 or bf16), target: (N,) ints -> scalar f32."""
    N, V = x.shape
    assert V == size, (V, size)
    assert size > 2, "fill = smoothing / (size - 2) requires size > 2"

    confidence = float(1.0 - smoothing)
    fill = float(smoothing) / float(size - 2)
    # Entropy part of KL is a compile-time constant per valid row; 0*log(0)
    # contributes 0 (KLDivLoss / xlogy convention).
    ent_row = 0.0
    if confidence > 0.0:
        ent_row += confidence * math.log(confidence)
    if fill > 0.0:
        ent_row += (size - 2) * fill * math.log(fill)

    # Tile sizes: sublane multiple depends on dtype packing, lane multiple 128.
    sub = {4: 8, 2: 16, 1: 32}.get(jnp.dtype(x.dtype).itemsize, 8)
    tn = max(sub, (int(tn) // sub) * sub)
    tv = max(128, (int(tv) // 128) * 128)
    tn = min(tn, _round_up(N, sub))                # tiny problems -> one tile
    tv = min(tv, _round_up(V, 128))

    n_pad = _round_up(N, tn)
    v_pad = _round_up(V, tv)
    tgt = target.astype(jnp.int32)
    if n_pad != N or v_pad != V:
        # Zero-padded columns contribute fill*0 = 0; padded rows get
        # target == padding_idx and are masked out entirely.
        x = jnp.pad(x, ((0, n_pad - N), (0, v_pad - V)))
        tgt = jnp.pad(tgt, (0, n_pad - N), constant_values=padding_idx)
    tgt2d = tgt.reshape(n_pad, 1)

    n_tiles, v_tiles = n_pad // tn, v_pad // tv
    kernel = functools.partial(
        _label_smoothing_kernel,
        confidence=confidence, fill=fill, ent_row=ent_row,
        padding_idx=padding_idx, tv=tv,
        pad_tile=padding_idx // tv, pad_local=padding_idx % tv)

    out = pl.pallas_call(
        kernel,
        grid=(n_tiles, v_tiles),
        in_specs=[
            pl.BlockSpec((tn, tv), lambda i, j: (i, j)),
            pl.BlockSpec((tn, 1), lambda i, j: (i, 0)),
        ],
        out_specs=pl.BlockSpec((8, 128), lambda i, j: (i, 0)),
        out_shape=jax.ShapeDtypeStruct((n_tiles * 8, 128), jnp.float32),
        compiler_params=pltpu.CompilerParams(
            dimension_semantics=("parallel", "arbitrary"),
            vmem_limit_bytes=32 * 1024 * 1024),
        cost_estimate=pl.CostEstimate(
            flops=6 * n_pad * v_pad,
            transcendentals=0,
            bytes_accessed=n_pad * v_pad * jnp.dtype(x.dtype).itemsize
            + n_pad * 4 + n_tiles * 8 * 128 * 4),
    )(x, tgt2d)

    # Each N-tile's partial loss is broadcast across its (8,128) block; pick
    # one representative per tile and reduce.
    return jnp.sum(out[::8, 0])


def _reference_loss(x, target, *, size, padding_idx, smoothing):
    # plain-JAX reference (mirrors the PyTorch module)
    x = x.astype(jnp.float32)
    N, V = x.shape
    confidence = 1.0 - smoothing
    fill = smoothing / (size - 2)
    col = jnp.arange(V)[None, :]
    tgt = target[:, None]
    td = jnp.where(col == tgt, confidence, fill)
    td = jnp.where(col == padding_idx, 0.0, td)
    td = jnp.where(tgt == padding_idx, 0.0, td)
    safe = jnp.where(td > 0, td, 1.0)
    return jnp.sum(jnp.where(td > 0, td * (jnp.log(safe) - x), 0.0))


if __name__ == "__main__":
    N, SIZE = 12, 384            # small, but multi-tile with the tiles below
    PADDING_IDX = 0
    SMOOTHING = 0.1

    key = jax.random.PRNGKey(0)
    kx, kt = jax.random.split(key)
    logits = jax.random.normal(kx, (N, SIZE), dtype=jnp.float32)
    x = jax.nn.log_softmax(logits, axis=-1)            # model output: log-probs
    target = jax.random.randint(kt, (N,), 0, SIZE, dtype=jnp.int32)
    target = target.at[3].set(PADDING_IDX)             # include a padded position

    ref = _reference_loss(x, target, size=SIZE, padding_idx=PADDING_IDX,
                          smoothing=SMOOTHING)

    # multi-tile grid (row padding 12 -> 16, 3 V-tiles of 128)
    loss_tiled = label_smoothing_loss(
        x, target, size=SIZE, padding_idx=PADDING_IDX, smoothing=SMOOTHING,
        tn=8, tv=128)
    loss_tiled = jax.block_until_ready(loss_tiled)
    assert jnp.allclose(loss_tiled, ref, rtol=1e-4, atol=1e-3), (loss_tiled, ref)

    # default (large-tile) path -> single grid step
    loss_big = label_smoothing_loss(
        x, target, size=SIZE, padding_idx=PADDING_IDX, smoothing=SMOOTHING)
    loss_big = jax.block_until_ready(loss_big)
    assert jnp.allclose(loss_big, ref, rtol=1e-4, atol=1e-3), (loss_big, ref)

    # bf16 ingestion path (half the HBM bytes; kernel upcasts to f32 internally)
    x_bf16 = x.astype(jnp.bfloat16)
    ref_bf16 = _reference_loss(x_bf16.astype(jnp.float32), target, size=SIZE,
                               padding_idx=PADDING_IDX, smoothing=SMOOTHING)
    loss_bf16 = label_smoothing_loss(
        x_bf16, target, size=SIZE, padding_idx=PADDING_IDX, smoothing=SMOOTHING,
        tn=16, tv=128)
    loss_bf16 = jax.block_until_ready(loss_bf16)
    assert jnp.allclose(loss_bf16, ref_bf16, rtol=1e-3, atol=1e-3), (loss_bf16, ref_bf16)

    print("KERNEL_OK")
</pallas_src>

<mosaic_0001>
module attributes {stable_mosaic.version = 11 : i64} {
  func.func @_label_smoothing_kernel(%arg0: i32, %arg1: i32, %arg2: memref<8x128xf32, #tpu.memory_space<vmem>>, %arg3: memref<8x1xi32, #tpu.memory_space<vmem>>, %arg4: memref<8x128xf32, #tpu.memory_space<vmem>>) attributes {dimension_semantics = [#tpu.dimension_semantics<parallel>, #tpu.dimension_semantics<arbitrary>], iteration_bounds = array<i64: 2, 3>, scalar_prefetch = 0 : i64, scratch_operands = 0 : i64, tpu.core_type = #tpu.core_type<tc>, window_params = [{transform_indices = @transform_0, window_bounds = array<i64: 8, 128>}, {transform_indices = @transform_1, window_bounds = array<i64: 8, 1>}, {transform_indices = @transform_2, window_bounds = array<i64: 8, 128>}]} {
    %c0 = arith.constant 0 : index
    %c0_0 = arith.constant 0 : index
    %0 = vector.load %arg2[%c0, %c0_0] : memref<8x128xf32, #tpu.memory_space<vmem>>, vector<8x128xf32>
    %c0_1 = arith.constant 0 : index
    %c0_2 = arith.constant 0 : index
    %1 = vector.load %arg3[%c0_1, %c0_2] : memref<8x1xi32, #tpu.memory_space<vmem>>, vector<8x1xi32>
    %c0_i32 = arith.constant 0 : i32
    %2 = vector.broadcast %c0_i32 : i32 to vector<8x1xi32>
    %3 = arith.cmpi ne, %1, %2 : vector<8x1xi32>
    %c0_i32_3 = arith.constant 0 : i32
    %4 = arith.cmpi eq, %arg1, %c0_i32_3 : i32
    %5 = arith.extui %4 : i1 to i32
    %c0_i32_4 = arith.constant 0 : i32
    %6 = arith.cmpi ne, %5, %c0_i32_4 : i32
    scf.if %6 {
      %32 = arith.extui %3 : vector<8x1xi1> to vector<8x1xi32>
      %33 = arith.sitofp %32 : vector<8x1xi32> to vector<8x1xf32>
      %cst_15 = arith.constant dense<0.000000e+00> : vector<1xf32>
      %34 = vector.multi_reduction <add>, %33, %cst_15 [0] : vector<8x1xf32> to vector<1xf32>
      %35 = vector.shape_cast %34 : vector<1xf32> to vector<1x1xf32>
      %cst_16 = arith.constant -0.919625044 : f32
      %36 = vector.broadcast %cst_16 : f32 to vector<1x1xf32>
      %37 = arith.mulf %35, %36 : vector<1x1xf32>
      %38 = vector.shape_cast %37 : vector<1x1xf32> to vector<1x1xf32>
      %39 = vector.broadcast %38 : vector<1x1xf32> to vector<8x128xf32>
      %c0_17 = arith.constant 0 : index
      %c0_18 = arith.constant 0 : index
      %40 = vector.load %arg4[%c0_17, %c0_18] : memref<8x128xf32, #tpu.memory_space<vmem>>, vector<8x128xf32>
      tpu.vector_store %arg4[%c0_17, %c0_18], %39 {strides = array<i32>} : memref<8x128xf32, #tpu.memory_space<vmem>>, vector<8x128xf32>,
    } else {
    }
    %cst = arith.constant 0.000000e+00 : f32
    %7 = vector.shape_cast %3 : vector<8x1xi1> to vector<8x1xi1>
    %8 = vector.broadcast %7 : vector<8x1xi1> to vector<8x128xi1>
    %9 = vector.broadcast %cst : f32 to vector<8x128xf32>
    %10 = arith.select %8, %0, %9 : vector<8x128xi1>, vector<8x128xf32>
    %11 = tpu.iota {dimensions = array<i32: 1>} : vector<8x128xi32>
    %c128_i32 = arith.constant 128 : i32
    %12 = arith.muli %arg1, %c128_i32 : i32
    %13 = vector.broadcast %12 : i32 to vector<8x128xi32>
    %14 = arith.addi %11, %13 : vector<8x128xi32>
    %15 = vector.broadcast %1 : vector<8x1xi32> to vector<8x128xi32>
    %16 = arith.cmpi eq, %14, %15 : vector<8x128xi32>
    %cst_5 = arith.constant 0.899999976 : f32
    %cst_6 = arith.constant 2.61780107E-4 : f32
    %17 = vector.broadcast %cst_5 : f32 to vector<8x128xf32>
    %18 = vector.broadcast %cst_6 : f32 to vector<8x128xf32>
    %19 = arith.select %16, %17, %18 : vector<8x128xi1>, vector<8x128xf32>
    %20 = arith.mulf %19, %10 : vector<8x128xf32>
    %cst_7 = arith.constant dense<0.000000e+00> : vector<8xf32>
    %21 = vector.multi_reduction <add>, %20, %cst_7 [1] : vector<8x128xf32> to vector<8xf32>
    %22 = vector.shape_cast %21 : vector<8xf32> to vector<8x1xf32>
    %cst_8 = arith.constant dense<0.000000e+00> : vector<1xf32>
    %23 = vector.multi_reduction <add>, %22, %cst_8 [0] : vector<8x1xf32> to vector<1xf32>
    %24 = vector.shape_cast %23 : vector<1xf32> to vector<1x1xf32>
    %c0_9 = arith.constant 0 : index
    %c0_10 = arith.constant 0 : index
    %25 = vector.load %arg4[%c0_9, %c0_10] : memref<8x128xf32, #tpu.memory_space<vmem>>, vector<8x128xf32>
    %26 = vector.broadcast %24 : vector<1x1xf32> to vector<8x128xf32>
    %27 = arith.subf %25, %26 : vector<8x128xf32>
    %c0_11 = arith.constant 0 : index
    %c0_12 = arith.constant 0 : index
    %28 = vector.load %arg4[%c0_11, %c0_12] : memref<8x128xf32, #tpu.memory_space<vmem>>, vector<8x128xf32>
    tpu.vector_store %arg4[%c0_11, %c0_12], %27 {strides = array<i32>} : memref<8x128xf32, #tpu.memory_space<vmem>>, vector<8x128xf32>,
    %c0_i32_13 = arith.constant 0 : i32
    %29 = arith.cmpi eq, %arg1, %c0_i32_13 : i32
    %30 = arith.extui %29 : i1 to i32
    %c0_i32_14 = arith.constant 0 : i32
    %31 = arith.cmpi ne, %30, %c0_i32_14 : i32
    scf.if %31 {
      %32 = vector.extract_strided_slice %10 {offsets = [0, 0], sizes = [8, 1], strides = [1, 1]} : vector<8x128xf32> to vector<8x1xf32>
      %cst_15 = arith.constant dense<0.000000e+00> : vector<1xf32>
      %33 = vector.multi_reduction <add>, %32, %cst_15 [0] : vector<8x1xf32> to vector<1xf32>
      %34 = vector.shape_cast %33 : vector<1xf32> to vector<1x1xf32>
      %c0_16 = arith.constant 0 : index
      %c0_17 = arith.constant 0 : index
      %35 = vector.load %arg4[%c0_16, %c0_17] : memref<8x128xf32, #tpu.memory_space<vmem>>, vector<8x128xf32>
      %cst_18 = arith.constant 2.61780107E-4 : f32
      %36 = vector.broadcast %cst_18 : f32 to vector<1x1xf32>
      %37 = arith.mulf %36, %34 : vector<1x1xf32>
      %38 = vector.broadcast %37 : vector<1x1xf32> to vector<8x128xf32>
      %39 = arith.addf %35, %38 : vector<8x128xf32>
      %c0_19 = arith.constant 0 : index
      %c0_20 = arith.constant 0 : index
      %40 = vector.load %arg4[%c0_19, %c0_20] : memref<8x128xf32, #tpu.memory_space<vmem>>, vector<8x128xf32>
      tpu.vector_store %arg4[%c0_19, %c0_20], %39 {strides = array<i32>} : memref<8x128xf32, #tpu.memory_space<vmem>>, vector<8x128xf32>,
    } else {
    }
    return
  }
  func.func @transform_0(%arg0: i32, %arg1: i32) -> (i32, i32) {
    %c0_i32 = arith.constant 0 : i32
    return %arg0, %arg1 : i32, i32
  }
  func.func @transform_1(%arg0: i32, %arg1: i32) -> (i32, i32) {
    %c0_i32 = arith.constant 0 : i32
    %c0_i32_0 = arith.constant 0 : i32
    return %arg0, %c0_i32 : i32, i32
  }
  func.func @transform_2(%arg0: i32, %arg1: i32) -> (i32, i32) {
    %c0_i32 = arith.constant 0 : i32
    %c0_i32_0 = arith.constant 0 : i32
    return %arg0, %c0_i32 : i32, i32
  }
}

</mosaic_0001>

<bundles_post_ra>
// kernel: tpu_custom_call.1
= control target key start
LH: loop header
LB: loop body
LE: loop exit
PB: predicated region body
PF: predicated region fallthrough
CT: control target
= control target key end

     0   :  { %7 = vsyncpa [#allocation3], 0  ;;  %s871_s0 = inlined_call_operand.hbm [shape: f32[16,384], index: 0, kind: input, shape index: {}]   ;;  %s872_s1 = inlined_call_operand.vmem [shape: s32[16,1], index: 1, kind: input, shape index: {}]   ;;  %s873_s2 = inlined_call_operand.hbm [shape: f32[16,128], index: 2, kind: output, shape index: {}]  }
   0x1   :  { %9 = vsyncpa [#allocation3 + $0x1], 0 }
   0x2   :  { %10 = vsyncpa [#allocation4], 0 }
   0x3   :  { %12 = vsyncpa [#allocation4 + $0x1], 0  ;;  %s680_s9 = smov 0   ;;  %s682_s10 = smov 0  }
   0x4   :  { %s684_s11 = smov 0   ;;  %s686_s12 = smov 0  }
   0x5   :  { %s688_s13 = smov 0   ;;  %s690_s14 = smov 0  }
   0x6   :  { %s692_s15 = smov 0   ;;  %s694_s16 = smov 0  }
   0x7   :  { %s696_s17 = smov 0   ;;  %s698_s18 = smov 0  }
   0x8   :  { %s700_s19 = smov 0  }
   0x9 LB: > { %s377_s20 = sadd.s32 4294967295, %s658_s19   ;;  %s378_s21 = sadd.s32 4294967294, %s658_s19   ;;  %s658_s19 = sphi %s700_s19, %s18_s19   ;;  %s654_s18 = sphi %s698_s18, %s893_s18   ;;  %s650_s17 = sphi %s696_s17, %s892_s17   ;;  %s646_s16 = sphi %s694_s16, %s891_s16   ;;  %s642_s15 = sphi %s692_s15, %s890_s15   ;;  %s638_s14 = sphi %s690_s14, %s889_s14   ;;  %s634_s13 = sphi %s688_s13, %s888_s13   ;;  %s630_s12 = sphi %s686_s12, %s887_s12   ;;  %s626_s11 = sphi %s684_s11, %s886_s11   ;;  %s622_s10 = sphi %s682_s10, %s885_s10   ;;  %s618_s9 = sphi %s680_s9, %s884_s9  }
   0xa   : > { %s27_s22 = sadd.s32 1, %s650_s17  ;;  %s30_s23 = sadd.s32 1, %s654_s18 }
   0xb   : > { %p28_p0 = scmp.ge.s32.totalorder %s27_s22, 3  ;;  %s39_s24 = sadd.s32 1, %s638_s14 }
   0xc   : > { %p46_p1 = scmp.ne.s32.totalorder %s638_s14, %s634_s13  ;;  %p47_p2 = scmp.eq.s32.totalorder %s658_s19, 0 }
   0xd   : > { %s895_s22 = smov (%p28_p0, %s27_s22), 0  ;;  %s897_s23 = smov (!%p28_p0, %s30_s23), %s654_s18 }
   0xe   : > { %876 = sst [smem:[#allocation8_spill]] %s895_s22  ;;  %s35_s25 = ssub.s32 %s650_s17, %s895_s22 }
   0xf   : > { %p746_p3 = por %p47_p2, %p46_p1  ;;  %p32_p4 = scmp.ge.s32.totalorder %s897_s23, 2 }
  0x10   : > { %p52_p5 = scmp.ne.s32.totalorder %s634_s13, %s630_s12  ;;  %p53_p6 = scmp.eq.s32.totalorder %s377_s20, 0 }
  0x11   : > { %s91_s27 = sadd.s32 1, %s626_s11  ;;  %s899_s23 = smov (%p32_p4, %s897_s23), 0 }
  0x12   : > { %878 = sst [smem:[#allocation9_spill]] %s899_s23  ;;  %p754_p7 = por %p53_p6, %p52_p5 }
  0x13   : > { %p101_p8 = scmp.ne.s32.totalorder %s626_s11, %s622_s10  ;;  %s34_s29 = ssub.s32 %s654_s18, %s899_s23 }
  0x14   : > { %p102_p9 = scmp.eq.s32.totalorder %s377_s20, 5  ;;  %s36_s30 = sor.u32 %s35_s25, %s34_s29 }
  0x15   : > { %p89_p10 = scmp.eq.s32.totalorder %s34_s29, 0  ;;  %p37_p11 = scmp.eq.s32.totalorder %s36_s30, 0 }
  0x16   : > { %p762_p12 = por %p102_p9, %p101_p8  ;;  %p107_p13 = scmp.ne.s32.totalorder %s622_s10, %s618_s9 }
  0x17   : > { %s767_s4 = scalar_select %p89_p10, %s626_s11, %s91_s27  }
  0x18   : > { %s770_s5 = scalar_select %p37_p11, %s638_s14, %s39_s24  }
  0x19   : > { %p108_p0 = scmp.eq.s32.totalorder %s378_s21, 5  ;;  %p408_p1 = scmp.lt.s32.totalorder %s658_s19, 6 }
  0x1a   : > { %s128_s7 = sand.u32 1, %s638_s14   ;;  %s395_s12 = smul.u32 3, %s654_s18 }
  0x1b   : > { %p775_p2 = por %p108_p0, %p107_p13  ;;  %s381_s8 = sshll.u32 %s128_s7, 3 }
  0x1c   : > { %s132_s20 = scalar_lea.vmem [#allocation2], %s381_s8  ;;  %p401_p4 = pnand %p408_p1, %p746_p3 }
  0x1d   : > { %s142_s25 = sshll.u32 %s132_s20, 4  ;;  %s136_s27 = sadd.s32 %s650_s17, %s395_s12  ;;  %s143_s25 = int_to_ptr.vmem [resolvable:$true] %s142_s25 }
  0x1e   : > { %s382_s29 = sshll.u32 %s136_s27, 3  ;;  %p383_p5 = scmp.ge.s32.totalorder %s658_s19, 1 }
  0x1f   : > { %s138_s23 = scalar_lea.hbm %s871_s0, %s382_s29  ;;  %p154_p6 = scmp.lt.s32.totalorder %s658_s19, 7 }
  0x20   : > { %s140_s21 = sshll.u32 %s138_s23, 4  ;;  %s129_s22 = scalar_lea.sflag [#allocation3], %s128_s7  ;;  %s141_s21 = int_to_ptr.hbm [resolvable:$true] %s140_s21 }
  0x21   : > { %403 = dma.hbm_to_vmem [thread:$0]  (!%p401_p4), %s141_s21, 128, %s143_s25, %s129_s22  }
  0x22   : > { %p155_p8 = pnand %p383_p5, %p154_p6 }
  0x23   : > { %s160_s8 = sand.u32 (!%p155_p8), 1, %s634_s13  }
  0x24   : > { %158 = sbr.rel (%p155_p8) target bundleno = 592 (0x250), region = 28  ;;  %s384_s26 = sshll.u32 (!%p155_p8), %s160_s8, 3 }
  0x25   : > { %s161_s20 = scalar_lea.sflag (!%p155_p8), [#allocation3], %s160_s8  ;;  %s164_s12 = scalar_lea.vmem (!%p155_p8), [#allocation2], %s384_s26 }
  0x29   : > { %609 = dma.done.wait (%p754_p7), %s161_s20, 128  }
  0x2a   : > { %611 = vsyncadd (%p754_p7), %s161_s20, 4294967168  ;;  %p190_p3 = scmp.lt.s32.totalorder %s646_s16, 1  ;;  %s187_s23 = sand.u32 1, %s622_s10   ;;  %v194_v0 = vld [vmem:[%s164_s12] sm:$0xff] }
  0x2b   : > { %s385_s22 = sshll.u32 %s187_s23, 3  ;;  %p387_p7 = scmp.ne.s32.totalorder %s642_s15, 0 }
  0x2c   : > { %s191_s7 = scalar_select %p190_p3, %s646_s16, 1 }
  0x2d   : > { %s802_s30 = scalar_lea.vmem [#allocation5], %s385_s22  ;;  %200 = sbr.rel (%p387_p7) target bundleno = 183 (0xb7), region = 36 }
  0x2e   : > { %s386_s25 = sshll.u32 %s191_s7, 3 }
  0x2f   : > { %s193_s24 = scalar_lea.vmem %s872_s1, %s386_s25 }
  0x30   : > { %v195_v1 = vld [vmem:[%s193_s24] sm:$0xff] }
  0x31   : > { %vm196_vm0 = vcmp.ne.s32.totalorder %v195_v1, 0 }
  0x32   : > { %vm203_vm1 = vcmask 7168   ;;  %v660_v2 = vmov 0   ;;  %v661_v3 = vmov 0.0  }
  0x33   : > { %503 = vset.pattern.permute.xlu0 %v660_v2  ;;  %v388_v4 = vsel %vm196_vm0, 1.0, %v661_v3 }
  0x34   : > { %v204_v5 = vsel %vm203_vm1, %v388_v4, 0.0 }
  0x35   : > { %v205_v6 = vrot.slane %v204_v5, 4 }
  0x37   : > { %v206_v7 = vadd.f32 %v205_v6, %v204_v5 }
  0x39   : > { %v207_v8 = vrot.slane %v206_v7, 2 }
  0x3b   : > { %v208_v9 = vadd.f32 %v207_v8, %v206_v7 }
  0x3d   : > { %v209_v10 = vrot.slane %v208_v9, 1 }
  0x3f   : > { %v210_v11 = vadd.f32 %v209_v10, %v208_v9 }
  0x41   : > { %v211_v12 = vmul.f32 -0.91962504, %v210_v11 }
  0x43   : > { %214 = vperm.xlu0 %503, %v211_v12  }
  0xb5   : > { %v215_v13 = vpop.permute.xlu0 %214 }
  0xb6   : > { %217 = vst [vmem:[%s802_s30] sm:$0xff] %v215_v13 }
  0xb7 PF: > { %v662_v14 = vmov 0   ;;  %v224_v16 = vlaneseq  ;;  %s389_s28 = sshll.u32 %s642_s15, 7  ;;  %v663_v23 = vmov 0.0002617801  }
  0xb8   : > { %504 = vset.pattern.permute.xlu0 %v662_v14  ;;  %v218_v15 = vsel %vm196_vm0, 1, %v662_v14  ;;  %v227_v19 = vstv %s389_s28 }
  0xb9   : > { %220 = vperm.xlu0 %504, %v218_v15   ;;  %v225_v18 = vand.u32 127, %v224_v16 }
  0xbb   : > { %v228_v20 = vadd.s32 %v227_v19, %v225_v18 }
  0xbd   : > { %v243_v32 = vld [vmem:[%s802_s30] sm:$0xff] }
  0xc1   : > { %230 = vperm.xlu0 %504, %v195_v1  }
 0x12b   : > { %v221_v17 = vpop.permute.xlu0 %220 }
 0x12c   : > { %vm222_vm2 = vcmp.eq.s32.totalorder %v221_v17, 1 }
 0x12d   : > { %v223_v22 = vsel %vm222_vm2, %v194_v0, 0.0 }
 0x133   : > { %v231_v21 = vpop.permute.xlu0 %230 }
 0x134   : > { %vm232_vm3 = vcmp.eq.s32.totalorder %v228_v20, %v231_v21 }
 0x135   : > { %v233_v24 = vsel %vm232_vm3, 0.9, %v663_v23 }
 0x136   : > { %v234_v25 = vmul.f32 %v233_v24, %v223_v22 }
 0x138   : > { %235 = vadd.xlane.f32.xlu1 %v234_v25 }
 0x1ab   : > { %v236_v26 = vpop.xlane.xlu1 %235 }
 0x1ac   : > { %v237_v27 = vrot.slane %v236_v26, 4 }
 0x1ae   : > { %v238_v28 = vadd.f32 %v237_v27, %v236_v26 }
 0x1b0   : > { %v239_v29 = vrot.slane %v238_v28, 2 }
 0x1b2   : > { %v240_v30 = vadd.f32 %v239_v29, %v238_v28 }
 0x1b4   : > { %v241_v31 = vrot.slane %v240_v30, 1 }
 0x1b6   : > { %v242_v33 = vadd.f32 %v241_v31, %v240_v30  ;;  %248 = sbr.rel (%p387_p7) target bundleno = 577 (0x241), region = 40 }
 0x1b8   : > { %v244_v34 = vsub.f32 %v243_v32, %v242_v33 }
 0x1ba   : > { %245 = vst [vmem:[%s802_s30] sm:$0xff] %v244_v34 }
 0x1bb   : > { %vm249_vm4 = vcmask 7168   ;;  %v664_v35 = vmov 0  }
 0x1bc   : > { %505 = vset.pattern.permute.xlu0 %v664_v35  ;;  %v250_v36 = vsel %vm249_vm4, %v223_v22, 0.0 }
 0x1bd   : > { %v251_v37 = vrot.slane %v250_v36, 4 }
 0x1bf   : > { %v252_v38 = vadd.f32 %v251_v37, %v250_v36 }
 0x1c1   : > { %v253_v39 = vrot.slane %v252_v38, 2  ;;  %v257_v44 = vld [vmem:[%s802_s30] sm:$0xff] }
 0x1c3   : > { %v254_v40 = vadd.f32 %v253_v39, %v252_v38 }
 0x1c5   : > { %v255_v41 = vrot.slane %v254_v40, 1 }
 0x1c7   : > { %v256_v42 = vadd.f32 %v255_v41, %v254_v40 }
 0x1c9   : > { %v258_v43 = vmul.f32 0.0002617801, %v256_v42 }
 0x1cb   : > { %261 = vperm.xlu0 %505, %v258_v43  }
 0x23d   : > { %v262_v45 = vpop.permute.xlu0 %261 }
 0x23e   : > { %v264_v46 = vadd.f32 %v262_v45, %v257_v44 }
 0x240   : > { %265 = vst [vmem:[%s802_s30] sm:$0xff] %v264_v46 }
 0x241 PF: > { %s392_s15 = sshll.u32 %s646_s16, 3  ;;  %s279_s20 = sshll.u32 %s802_s30, 4  ;;  %s280_s20 = int_to_ptr.vmem [resolvable:$true] %s279_s20 }
 0x242   : > { %s277_s26 = scalar_lea.hbm %s873_s2, %s392_s15  ;;  %s267_s22 = scalar_lea.sflag [#allocation4], %s187_s23 }
 0x243   : > { %s281_s12 = sshll.u32 %s277_s26, 4  ;;  %s556_s16 = scalar_lea.hbm %s873_s2, 16  ;;  %s282_s12 = int_to_ptr.hbm [resolvable:$true] %s281_s12 }
 0x244   : > { %s550_s7 = sshra.s32 %s282_s12, 4  ;;  %s551_s7 = int_to_ptr.hbm [resolvable:$true] %s550_s7 }
 0x245   : > { %s552_s25 = scalar_lea.hbm %s551_s7, 8  ;;  %p557_p13 = scmp.lt.s32.totalorder %s551_s7, %s873_s2 }
 0x246   : > { %p553_p9 = scmp.ne.s32.totalorder %s551_s7, %s552_s25  ;;  %p558_p0 = scmp.lt.s32.totalorder %s556_s16, %s552_s25 }
 0x248   : > { %p554_p10 = pnand %p553_p9, %p762_p12  ;;  %p559_p1 = por %p558_p0, %p557_p13 }
 0x24a   : > { %p555_p11 = pneg %p554_p10 }
 0x24c   : > { %p560_p4 = pnand %p559_p1, %p555_p11 }
 0x24e   : > { %563 = shalt.err (!%p560_p4)
}
 0x24f   : > { %398 = dma.vmem_to_hbm [thread:$0]  (%p762_p12), %s280_s20, 128, %s282_s12, %s267_s22  }
 0x250 PF: > { %p409_p5 = scmp.ge.s32.totalorder %s658_s19, 2  ;;  %s293_s23 = sand.u32 1, %s618_s9  }
 0x251   : > { %s294_s30 = scalar_lea.sflag [#allocation4], %s293_s23 }
 0x252   : > { %p405_p6 = pnand %p409_p5, %p775_p2 }
 0x254   : > { %p406_p8 = pneg %p405_p6 }
 0x256   : > { %613 = dma.done.wait (%p406_p8), %s294_s30, 128  }
 0x257   : > { %615 = vsyncadd (%p406_p8), %s294_s30, 4294967168  ;;  %s18_s19 = sadd.s32 1, %s658_s19   ;;  %s882_s3 = sld [smem:[#allocation8_spill]] }
 0x258   : > { %p15_p3 = scmp.ge.s32.totalorder %s18_s19, 8   ;;  %s883_s21 = sld [smem:[#allocation9_spill]] }
 0x259   : > { %s884_s9 = smov %s622_s10  ;;  %s885_s10 = smov %s626_s11 }
 0x25a   : > { %s886_s11 = smov %s767_s4  ;;  %s887_s12 = smov %s634_s13 }
 0x25b   : > { %s888_s13 = smov %s638_s14  ;;  %s889_s14 = smov %s770_s5 }
 0x25c   : > { %s890_s15 = smov %s650_s17  ;;  %s891_s16 = smov %s654_s18 }
 0x25d   : > { %s892_s17 = smov %s882_s3  ;;  %17 = sbr.rel (!%p15_p3) target bundleno = 9 (0x9), region = 84 }
 0x25e   : > { %s893_s18 = smov %s883_s21 }
 0x262   :  { %300 = vsyncpa [#allocation3], 1 }
 0x263   :  { %302 = vsyncpa [#allocation3 + $0x1], 1 }
 0x264   :  { %303 = vsyncpa [#allocation4], 1 }
 0x265   :  { %305 = vsyncpa [#allocation4 + $0x1], 1 }

</bundles_post_ra>
